<compile_context>
chip_gen: v5e
topology: v5e:2x2
jax: 0.10.0
libtpu: 0.0.40
codegen_flags: <defaults>
</compile_context>

<pallas_src>
import jax
import jax.numpy as jnp
from jax.experimental import pallas as pl
from jax.experimental.pallas import tpu as pltpu


def _encoder_kernel(scale_ref, x_ref, wt_ref, b_ref, o_ref):
    # x_ref : (TM, CK)      im2col patch tile (streamed per grid step)
    # wt_ref: (CK, O_pad)   conv weight, flattened/transposed/lane-padded (resident)
    # b_ref : (1, O_pad)    conv bias, lane-padded (resident)
    # scale_ref: (1, 1)     scalar output weight (SMEM)
    acc = jnp.dot(x_ref[...], wt_ref[...], preferred_element_type=jnp.float32)
    o_ref[...] = (acc + b_ref[...]) * scale_ref[0, 0]


def _round_up(x, m):
    return (x + m - 1) // m * m


def interval_observation_encoder(obs, conv_w, conv_b, out_weight):
    """obs: (B, W, C, F) f32; conv_w: (O, C, K); conv_b: (O,); out_weight: () scalar."""
    B, W, C, F = obs.shape
    O, Cw, K = conv_w.shape
    assert Cw == C, "Conv1d in_channels must equal observation channel dim"
    L = W * F
    L_out = L - K + 1
    assert L_out >= 1

    # --- glue (plain JAX): NCW layout + patch extraction ----------------------
    x_ncw = jnp.transpose(obs, (0, 2, 1, 3)).reshape(B, C, L).astype(jnp.float32)
    if L_out == 1:
        # Kernel spans the whole sequence -> no im2col gather, just a reshape.
        patches = x_ncw.reshape(B, C * K)
    else:
        # TODO(synk): for large L_out, fuse the K-fold im2col expansion into the
        # kernel (strided pl.ds window reads over x_ncw) instead of materializing
        # it in HBM; kept host-side here for the general (rare) case.
        tap_idx = jnp.arange(L_out)[:, None] + jnp.arange(K)[None, :]        # (L_out, K)
        patches = x_ncw[:, :, tap_idx]                                       # (B, C, L_out, K)
        patches = jnp.transpose(patches, (0, 2, 1, 3)).reshape(B * L_out, C * K)

    M = B * L_out
    CK = C * K

    # --- padding / tiling ------------------------------------------------------
    O_pad = _round_up(O, 128)        # lane-dense output -> unmasked full-width stores
    TM_TARGET = 512                  # 2 bufs * 512*CK*4B per stream; VMEM-safe on v7x
    M_pad = _round_up(M, 8)
    if M_pad <= TM_TARGET:
        TM = M_pad
    else:
        TM = TM_TARGET
        M_pad = _round_up(M, TM)
    num_tiles = M_pad // TM

    if M_pad != M:
        patches = jnp.pad(patches, ((0, M_pad - M), (0, 0)))

    w_flat_t = conv_w.reshape(O, CK).T.astype(jnp.float32)                   # (CK, O)
    bias_row = conv_b.astype(jnp.float32).reshape(1, O)
    if O_pad != O:
        w_flat_t = jnp.pad(w_flat_t, ((0, 0), (0, O_pad - O)))
        bias_row = jnp.pad(bias_row, ((0, 0), (0, O_pad - O)))
    scale = jnp.asarray(out_weight, jnp.float32).reshape(1, 1)

    cost = pl.CostEstimate(
        flops=2 * M_pad * CK * O_pad,
        transcendentals=0,
        bytes_accessed=4 * (M_pad * CK + CK * O_pad + M_pad * O_pad),
    )

    # --- Pallas hot path: tiled (TM, CK) @ (CK, O_pad) + bias, scaled ----------
    out = pl.pallas_call(
        _encoder_kernel,
        out_shape=jax.ShapeDtypeStruct((M_pad, O_pad), jnp.float32),
        grid_spec=pltpu.PrefetchScalarGridSpec(
            num_scalar_prefetch=0,
            grid=(num_tiles,),
            in_specs=[
                pl.BlockSpec(memory_space=pltpu.MemorySpace.SMEM),           # scalar weight
                pl.BlockSpec((TM, CK), lambda i: (i, 0)),                    # patch tile (streamed)
                pl.BlockSpec((CK, O_pad), lambda i: (0, 0)),                 # W^T (resident)
                pl.BlockSpec((1, O_pad), lambda i: (0, 0)),                  # bias (resident)
            ],
            out_specs=pl.BlockSpec((TM, O_pad), lambda i: (i, 0)),
        ),
        compiler_params=pltpu.CompilerParams(
            dimension_semantics=("parallel",)),                              # M tiles independent
        cost_estimate=cost,
    )(scale, patches, w_flat_t, bias_row)

    # --- glue: drop padding, back to Conv1d layout, torch.squeeze(dim=-1) ------
    out = out[:M, :O]
    out = out.reshape(B, L_out, O).transpose(0, 2, 1)                        # (B, O, L_out)
    if L_out == 1:
        out = out[..., 0]                                                    # (B, O)
    return out


def _reference(obs, conv_w, conv_b, out_weight):
    """Pure-JAX reference mirroring the PyTorch forward."""
    B, W, C, F = obs.shape
    x = jnp.transpose(obs, (0, 2, 1, 3)).reshape(B, C, W * F)
    y = jax.lax.conv_general_dilated(
        x, conv_w, window_strides=(1,), padding="VALID",
        dimension_numbers=("NCH", "OIH", "NCH"))
    y = y + conv_b[None, :, None]
    if y.shape[-1] == 1:
        y = y[..., 0]
    return y * out_weight


if __name__ == "__main__":
    # Shapes consistent with the module's intended use:
    # num_input_channel = channel_size = 4, kernel_size = window*feat so L_out = 1.
    batch, window, channels, feat = 2, 8, 4, 4
    num_output_channel = 32
    kernel_size = window * feat        # 32 -> conv output length 1 (squeezed)
    initial_output_weight_value = 0.5

    key = jax.random.PRNGKey(0)
    k_obs, k_w, k_b, k_obs2 = jax.random.split(key, 4)

    obs = jax.random.normal(k_obs, (batch, window, channels, feat), dtype=jnp.float32)

    # Deterministic Conv1d-style init: U(-1/sqrt(fan_in), 1/sqrt(fan_in))
    fan_in = channels * kernel_size
    bound = 1.0 / jnp.sqrt(jnp.asarray(fan_in, jnp.float32))
    conv_w = jax.random.uniform(k_w, (num_output_channel, channels, kernel_size),
                                dtype=jnp.float32, minval=-bound, maxval=bound)
    conv_b = jax.random.uniform(k_b, (num_output_channel,), dtype=jnp.float32,
                                minval=-bound, maxval=bound)
    out_weight = jnp.float32(initial_output_weight_value)

    # --- check 1: module-sized toy shapes (single tile) ------------------------
    y = interval_observation_encoder(obs, conv_w, conv_b, out_weight)
    y = jax.block_until_ready(y)
    y_ref = _reference(obs, conv_w, conv_b, out_weight)
    assert y.shape == (batch, num_output_channel), y.shape
    assert jnp.allclose(y, y_ref, atol=1e-5, rtol=1e-5), float(jnp.max(jnp.abs(y - y_ref)))

    # --- check 2: larger batch to exercise the multi-tile / padded-M path ------
    big_batch = 600
    obs_big = jax.random.normal(k_obs2, (big_batch, window, channels, feat),
                                dtype=jnp.float32)
    y_big = interval_observation_encoder(obs_big, conv_w, conv_b, out_weight)
    y_big = jax.block_until_ready(y_big)
    y_big_ref = _reference(obs_big, conv_w, conv_b, out_weight)
    assert y_big.shape == (big_batch, num_output_channel), y_big.shape
    assert jnp.allclose(y_big, y_big_ref, atol=1e-5, rtol=1e-5), \
        float(jnp.max(jnp.abs(y_big - y_big_ref)))

    print("KERNEL_OK")
</pallas_src>

<mosaic_0001>
module attributes {stable_mosaic.version = 11 : i64} {
  func.func @_encoder_kernel(%arg0: i32, %arg1: memref<1x1xf32, #tpu.memory_space<smem>>, %arg2: memref<8x128xf32, #tpu.memory_space<vmem>>, %arg3: memref<128x128xf32, #tpu.memory_space<vmem>>, %arg4: memref<1x128xf32, #tpu.memory_space<vmem>>, %arg5: memref<8x128xf32, #tpu.memory_space<vmem>>) attributes {dimension_semantics = [#tpu.dimension_semantics<parallel>], iteration_bounds = array<i64: 1>, scalar_prefetch = 0 : i64, scratch_operands = 0 : i64, tpu.core_type = #tpu.core_type<tc>, window_params = [{transform_indices = @transform_0, window_bounds = array<i64: 1, 1>}, {transform_indices = @transform_1, window_bounds = array<i64: 8, 128>}, {pipeline_mode = #tpu.pipeline_mode<synchronous>, transform_indices = @transform_2, window_bounds = array<i64: 128, 128>}, {pipeline_mode = #tpu.pipeline_mode<synchronous>, transform_indices = @transform_3, window_bounds = array<i64: 1, 128>}, {transform_indices = @transform_4, window_bounds = array<i64: 8, 128>}]} {
    %c0 = arith.constant 0 : index
    %c0_0 = arith.constant 0 : index
    %0 = vector.load %arg2[%c0, %c0_0] : memref<8x128xf32, #tpu.memory_space<vmem>>, vector<8x128xf32>
    %c0_1 = arith.constant 0 : index
    %c0_2 = arith.constant 0 : index
    %1 = vector.load %arg3[%c0_1, %c0_2] : memref<128x128xf32, #tpu.memory_space<vmem>>, vector<128x128xf32>
    %cst = arith.constant dense<0.000000e+00> : vector<8x128xf32>
    %2 = tpu.matmul %0, %1, %cst {dimension_numbers = #tpu.dot_dimension_numbers<[1], [0], [0], [1], [0, 0, 1, 1], [], []>} : vector<8x128xf32>, vector<128x128xf32>, vector<8x128xf32> -> vector<8x128xf32>
    %c0_3 = arith.constant 0 : index
    %c0_4 = arith.constant 0 : index
    %3 = vector.load %arg4[%c0_3, %c0_4] : memref<1x128xf32, #tpu.memory_space<vmem>>, vector<1x128xf32>
    %4 = vector.broadcast %3 : vector<1x128xf32> to vector<8x128xf32>
    %5 = arith.addf %2, %4 : vector<8x128xf32>
    %c0_5 = arith.constant 0 : index
    %c0_6 = arith.constant 0 : index
    %6 = memref.load %arg1[%c0_5, %c0_6] : memref<1x1xf32, #tpu.memory_space<smem>>
    %7 = vector.broadcast %6 : f32 to vector<8x128xf32>
    %8 = arith.mulf %5, %7 : vector<8x128xf32>
    %c0_7 = arith.constant 0 : index
    %c0_8 = arith.constant 0 : index
    %9 = vector.load %arg5[%c0_7, %c0_8] : memref<8x128xf32, #tpu.memory_space<vmem>>, vector<8x128xf32>
    tpu.vector_store %arg5[%c0_7, %c0_8], %8 {strides = array<i32>} : memref<8x128xf32, #tpu.memory_space<vmem>>, vector<8x128xf32>,
    return
  }
  func.func @transform_0(%arg0: i32) -> (i32, i32) {
    %c0_i32 = arith.constant 0 : i32
    %c0_i32_0 = arith.constant 0 : i32
    %c0_i32_1 = arith.constant 0 : i32
    return %c0_i32, %c0_i32_0 : i32, i32
  }
  func.func @transform_1(%arg0: i32) -> (i32, i32) {
    %c0_i32 = arith.constant 0 : i32
    %c0_i32_0 = arith.constant 0 : i32
    return %arg0, %c0_i32 : i32, i32
  }
  func.func @transform_2(%arg0: i32) -> (i32, i32) {
    %c0_i32 = arith.constant 0 : i32
    %c0_i32_0 = arith.constant 0 : i32
    %c0_i32_1 = arith.constant 0 : i32
    return %c0_i32, %c0_i32_0 : i32, i32
  }
  func.func @transform_3(%arg0: i32) -> (i32, i32) {
    %c0_i32 = arith.constant 0 : i32
    %c0_i32_0 = arith.constant 0 : i32
    %c0_i32_1 = arith.constant 0 : i32
    return %c0_i32, %c0_i32_0 : i32, i32
  }
  func.func @transform_4(%arg0: i32) -> (i32, i32) {
    %c0_i32 = arith.constant 0 : i32
    %c0_i32_0 = arith.constant 0 : i32
    return %arg0, %c0_i32 : i32, i32
  }
}

</mosaic_0001>

<bundles_post_ra>
// kernel: tpu_custom_call.1
= control target key start
LH: loop header
LB: loop body
LE: loop exit
PB: predicated region body
PF: predicated region fallthrough
CT: control target
= control target key end

     0   :  { %10 = vsyncpa [#allocation4], 0  ;;  %s241_s0 = inlined_call_operand.<no memory space> [shape: f32[1,1], index: 0, kind: input, shape index: {}]   ;;  %s242_s1 = inlined_call_operand.hbm [shape: f32[8,128], index: 1, kind: input, shape index: {}]   ;;  %s243_s2 = inlined_call_operand.hbm [shape: f32[128,128], index: 2, kind: input, shape index: {}]   ;;  %s244_s3 = inlined_call_operand.vmem [shape: f32[1,128], index: 3, kind: input, shape index: {}]   ;;  %s245_s4 = inlined_call_operand.hbm [shape: f32[8,128], index: 4, kind: output, shape index: {}]  }
   0x1   :  { %11 = vsyncpa [#allocation7], 0 }
   0x2   :  { %12 = vsyncpa [#allocation5], 0  ;;  %s20_s17 = sshll.u32 %s242_s1, 4  ;;  %s196_s18 = smov [#allocation3]   ;;  %s21_s17 = int_to_ptr.hbm [resolvable:$true] %s20_s17 }
   0x3   :  { %s22_s19 = sshll.u32 %s196_s18, 4  ;;  %s30_s22 = sshll.u32 %s243_s2, 4  ;;  %s23_s19 = int_to_ptr.vmem [resolvable:$true] %s22_s19  ;;  %s31_s22 = int_to_ptr.hbm [resolvable:$true] %s30_s22 }
   0x4   :  { %25 = dma.hbm_to_vmem [thread:$0]  %s21_s17, 128, %s23_s19, [#allocation4]  }
   0x5   :  { %s197_s23 = smov [#allocation6]   ;;  %s198_s25 = smov 128  }
   0x6   :  { %s32_s24 = sshll.u32 %s197_s23, 4  ;;  %s199_s26 = smov 8   ;;  %s33_s24 = int_to_ptr.vmem [resolvable:$true] %s32_s24 }
   0x7   :  { %38 = dma.hbm_to_vmem [thread:$0]  %s31_s22, 2048, %s33_s24, [#allocation7], %s198_s25, %s198_s25, %s199_s26  }
   0x8   :  { %190 = dma.done.wait [#allocation4], 128  }
   0x9   :  { %191 = vsyncadd [#allocation4], 4294967168 }
   0xa   :  { %192 = dma.done.wait [#allocation7], 2048  }
   0xb   :  { %193 = vsyncadd [#allocation7], 4294965248  ;;  %v65_v0 = vld [vmem:[#allocation6 + $0x78] sm:$0xff]  ;;  %v64_v1 = vld [vmem:[#allocation6 + $0x70] sm:$0xff]  ;;  %v91_v19 = vstv %s241_s0  ;;  %s200_s29 = smov [#allocation8]   ;;  %s101_s7 = sshll.u32 %s245_s4, 4  ;;  %s102_s7 = int_to_ptr.hbm [resolvable:$true] %s101_s7 }
   0xc   :  { %70 = vmatpush.msra.mxu0 %v65_v0  ;;  %v63_v2 = vld [vmem:[#allocation6 + $0x68] sm:$0xff]  ;;  %v62_v3 = vld [vmem:[#allocation6 + $0x60] sm:$0xff]  ;;  %v61_v4 = vld [vmem:[#allocation6 + $0x58] sm:$0xff]  ;;  %s99_s30 = sshll.u32 %s200_s29, 4  ;;  %s100_s30 = int_to_ptr.vmem [resolvable:$true] %s99_s30 }
   0xd   :  { %v60_v5 = vld [vmem:[#allocation6 + $0x50] sm:$0xff]  ;;  %v59_v6 = vld [vmem:[#allocation6 + $0x48] sm:$0xff]  ;;  %v58_v7 = vld [vmem:[#allocation6 + $0x40] sm:$0xff] }
   0xe   :  { %71 = vmatpush.msra.mxu0 %v64_v1  ;;  %v57_v8 = vld [vmem:[#allocation6 + $0x38] sm:$0xff]  ;;  %v56_v9 = vld [vmem:[#allocation6 + $0x30] sm:$0xff]  ;;  %v55_v10 = vld [vmem:[#allocation6 + $0x28] sm:$0xff] }
   0xf   :  { %v54_v11 = vld [vmem:[#allocation6 + $0x20] sm:$0xff]  ;;  %v53_v12 = vld [vmem:[#allocation6 + $0x18] sm:$0xff]  ;;  %v52_v13 = vld [vmem:[#allocation6 + $0x10] sm:$0xff] }
  0x10   :  { %72 = vmatpush.msra.mxu0 %v63_v2  ;;  %v51_v14 = vld [vmem:[#allocation6 + $0x8] sm:$0xff]  ;;  %v50_v15 = vld [vmem:[#allocation6] sm:$0xff]  ;;  %v49_v16 = vld [vmem:[#allocation3] sm:$0xff] }
  0x11   :  { %v117_v17 = vld [vmem:[%s244_s3] ss:$0 sm:$0xff] }
  0x12   :  { %73 = vmatpush.msra.mxu0 %v62_v3 }
  0x14   :  { %74 = vmatpush.msra.mxu0 %v61_v4 }
  0x16   :  { %75 = vmatpush.msra.mxu0 %v60_v5 }
  0x18   :  { %76 = vmatpush.msra.mxu0 %v59_v6 }
  0x1a   :  { %77 = vmatpush.msra.mxu0 %v58_v7 }
  0x1c   :  { %78 = vmatpush.msra.mxu0 %v57_v8 }
  0x1e   :  { %79 = vmatpush.msra.mxu0 %v56_v9 }
  0x20   :  { %80 = vmatpush.msra.mxu0 %v55_v10 }
  0x22   :  { %81 = vmatpush.msra.mxu0 %v54_v11 }
  0x24   :  { %82 = vmatpush.msra.mxu0 %v53_v12 }
  0x26   :  { %83 = vmatpush.msra.mxu0 %v52_v13 }
  0x28   :  { %84 = vmatpush.msra.mxu0 %v51_v14 }
  0x2a   :  { %85 = vmatpush.msra.mxu0 %v50_v15 }
  0x2b   :  { %86 = vmatmul.f32.vlgmr.msra.gmra.mxu0 %v49_v16 }
  0xa8   :  { %v87_v18 = vpop.f32.mrf.mxu0 }
  0xa9   :  { %v88_v20 = vadd.f32 %v117_v17, %v87_v18 }
  0xab   :  { %v92_v21 = vmul.f32 %v91_v19, %v88_v20 }
  0xad   :  { %93 = vst [vmem:[#allocation8] sm:$0xff] %v92_v21 }
  0xae   :  { %104 = dma.vmem_to_hbm [thread:$0]  %s100_s30, 128, %s102_s7, [#allocation5]  }
  0xaf   :  { %194 = dma.done.wait [#allocation5], 128  }
  0xb0   :  { %195 = vsyncadd [#allocation5], 4294967168 }
  0xb1   :  { %109 = vsyncpa [#allocation4], 1 }
  0xb2   :  { %110 = vsyncpa [#allocation7], 1 }
  0xb3   :  { %111 = vsyncpa [#allocation5], 1 }

</bundles_post_ra>
